<compile_context>
chip_gen: v7x
topology: tpu7x:2x2x1
jax: 0.10.0
libtpu: 0.0.40
codegen_flags: <defaults>
</compile_context>

<pallas_src>
import functools

import jax
import jax.numpy as jnp
from jax.experimental import pallas as pl
from jax.experimental.pallas import tpu as pltpu

PACK = 8        # original rows packed per lane-dense packed row
_GRANULE = 16   # sublane granule for packed-row tiles (safe for bf16 blocks)


def _activate(h, activation):
    if activation == "relu":
        return jnp.maximum(h, 0.0)
    # ELU(alpha=1.0), PyTorch semantics, one EUP transcendental per element.
    e = jnp.exp(jnp.minimum(h, 0.0))
    return jnp.where(h > 0, h, e - 1.0)


def _mlp_kernel(x_ref, w1_ref, b1_ref, w2_ref, b2_ref, w3_ref, b3_ref, g_ref,
                o_ref, *, activation):
    # Layer 1: packed rows (tile_r, PACK*in) @ block-diag W1 (PACK*in, PACK*h1)
    h = jnp.dot(x_ref[...], w1_ref[...],
                preferred_element_type=jnp.float32) + b1_ref[...]
    h = _activate(h, activation)

    # Layers 2/3: cast activations DOWN to the (possibly bf16) weight dtype
    # instead of upcasting the weights; accumulate in f32 on the MXU.
    h = jnp.dot(h.astype(w2_ref.dtype), w2_ref[...],
                preferred_element_type=jnp.float32) + b2_ref[...]
    h = _activate(h, activation)

    logits = jnp.dot(h.astype(w3_ref.dtype), w3_ref[...],
                     preferred_element_type=jnp.float32) + b3_ref[...]

    # Packed log_softmax: each packed row holds PACK rows x out_dim classes.
    # Any per-packed-row constant is a mathematically valid stabilizer, so use
    # the whole-packed-row max (one lane reduction); the per-row denominator is
    # broadcast back to each row's lanes with a tiny 0/1 matmul against g_ref.
    m = jnp.max(logits, axis=-1, keepdims=True)
    z = logits - m
    e = jnp.exp(z)
    gs = jnp.dot(e, g_ref[...], preferred_element_type=jnp.float32)
    # TODO(synk): gs could underflow to 0 (-> -inf) only if rows packed
    # together differ by >~88 in max logit; unreachable for this MLP.
    o_ref[...] = z - jnp.log(gs)


def _round_up(x, m):
    return ((x + m - 1) // m) * m


def _cdiv(a, b):
    return -(-a // b)


def _block_diag(w, k):
    """(din, dout) -> (k*din, k*dout) with k copies of w on the diagonal."""
    din, dout = w.shape
    eye = jnp.eye(k, dtype=w.dtype)
    return jnp.einsum("ab,io->aibo", eye, w).reshape(k * din, k * dout)


def dense_net_forward(x, params, *, activation="relu", tile_m=32768,
                      stream_bf16=True):
    """Fused denseNet forward.

    x: (N, input_dim) float32.  params: pre-transposed weights w{1,2,3}:
    (in, out) and biases b{1,2,3}: (1, out).

    tile_m: rows per grid step (original rows; internally /PACK packed rows,
    rounded to the sublane granule).  Default 32K rows ~ 2 MiB HBM per step.
    stream_bf16: stream x / weights as bf16 (f32 accumulation & softmax).
    """
    w1, b1, w2, b2, w3, b3 = (params["w1"], params["b1"], params["w2"],
                              params["b2"], params["w3"], params["b3"])
    N, in_dim = x.shape
    out_dim = w3.shape[1]

    # ---- lane-pack the row stream: (N, in_dim) -> (n8, PACK*in_dim) ---------
    n8 = _cdiv(N, PACK)
    # Packed-row tile: multiple of the granule; keep >= 2 grid steps whenever
    # possible (v7x: two TensorCores shard the parallel axis); never over-pad
    # tiny inputs.
    tile_r = max(_GRANULE, (int(tile_m) // (PACK * _GRANULE)) * _GRANULE)
    tile_r = min(tile_r, max(_GRANULE, _round_up(_cdiv(n8, 2), _GRANULE)))
    n8_pad = _round_up(n8, tile_r)

    rows_pad = n8_pad * PACK
    if rows_pad != N:
        x = jnp.pad(x, ((0, rows_pad - N), (0, 0)))
    xp = x.reshape(n8_pad, PACK * in_dim)      # free reinterpret (row-major)

    cdt = jnp.bfloat16 if stream_bf16 else jnp.float32
    xp = xp.astype(cdt)

    # Fold the 8-row packing into block-diagonal weights (built once per call
    # here; amortized across steps/calls in a real training loop).
    w1p = _block_diag(w1.astype(cdt), PACK)
    w2p = _block_diag(w2.astype(cdt), PACK)
    w3p = _block_diag(w3.astype(cdt), PACK)
    b1p = jnp.tile(b1, (1, PACK)).astype(jnp.float32)
    b2p = jnp.tile(b2, (1, PACK)).astype(jnp.float32)
    b3p = jnp.tile(b3, (1, PACK)).astype(jnp.float32)

    # 0/1 group-sum matrix for the packed log_softmax (f32 for exact sums).
    gidx = jnp.arange(PACK * out_dim) // out_dim
    gmat = (gidx[:, None] == gidx[None, :]).astype(jnp.float32)

    kernel = functools.partial(_mlp_kernel, activation=activation)

    # Weights / biases / gmat are tiny: full-array blocks with a constant
    # index_map keep them VMEM-resident for the whole grid.
    full = lambda arr: pl.BlockSpec(arr.shape, lambda i: (0,) * arr.ndim)

    out_p = pl.pallas_call(
        kernel,
        out_shape=jax.ShapeDtypeStruct((n8_pad, PACK * out_dim), jnp.float32),
        grid_spec=pltpu.PrefetchScalarGridSpec(
            num_scalar_prefetch=0,
            grid=(n8_pad // tile_r,),
            in_specs=[
                pl.BlockSpec((tile_r, PACK * in_dim), lambda i: (i, 0)),
                full(w1p), full(b1p), full(w2p), full(b2p),
                full(w3p), full(b3p), full(gmat),
            ],
            out_specs=pl.BlockSpec((tile_r, PACK * out_dim), lambda i: (i, 0)),
        ),
        compiler_params=pltpu.CompilerParams(
            dimension_semantics=("parallel",),
            vmem_limit_bytes=48 * 1024 * 1024),
    )(xp, w1p, b1p, w2p, b2p, w3p, b3p, gmat)

    # Free reinterpret back to per-row class vectors, drop padded rows.
    out = out_p.reshape(rows_pad, out_dim)
    return out[:N] if rows_pad != N else out


def init_params(key, input_dim, hidden_dim, out_dim):
    """Deterministic init mimicking nn.Linear (uniform +-1/sqrt(fan_in)).

    Weights are stored already transposed: (in, out); biases are (1, out)."""
    dims = [input_dim] + list(hidden_dim) + [out_dim]
    params = {}
    for idx in range(len(dims) - 1):
        fan_in, fan_out = dims[idx], dims[idx + 1]
        key, kw, kb = jax.random.split(key, 3)
        bound = 1.0 / jnp.sqrt(fan_in)
        params[f"w{idx + 1}"] = jax.random.uniform(
            kw, (fan_in, fan_out), jnp.float32, -bound, bound)
        params[f"b{idx + 1}"] = jax.random.uniform(
            kb, (1, fan_out), jnp.float32, -bound, bound)
    return params


def reference_forward(x, params, activation="relu"):
    def act(h):
        if activation == "relu":
            return jnp.maximum(h, 0.0)
        return jnp.where(h > 0, h, jnp.expm1(h))

    h = act(x @ params["w1"] + params["b1"])
    h = act(h @ params["w2"] + params["b2"])
    logits = h @ params["w3"] + params["b3"]
    return jax.nn.log_softmax(logits, axis=1)


if __name__ == "__main__":
    # denseNet(input_dim=16, hidden_dim=[32, 32], out_dim=8,
    #          activation='relu', datasetName='ogbn-products')
    input_dim, hidden_dim, out_dim = 16, [32, 32], 8
    N = 1000  # not a multiple of PACK*tile -> exercises padding + 2-step grid

    key = jax.random.PRNGKey(0)
    key, kx = jax.random.split(key)
    x = jax.random.normal(kx, (N, input_dim), jnp.float32)
    params = init_params(key, input_dim, hidden_dim, out_dim)

    ref = reference_forward(x, params, activation="relu")

    # f32 path, multiple grid steps (tile_m=512 -> tile_r=64 -> 2 steps).
    out = jax.block_until_ready(
        dense_net_forward(x, params, activation="relu", tile_m=512,
                          stream_bf16=False))
    assert out.shape == (N, out_dim)
    assert jnp.allclose(out, ref, atol=1e-5, rtol=1e-5), "relu mismatch"

    # elu path, f32, default (clamped) tile.
    out_elu = jax.block_until_ready(
        dense_net_forward(x, params, activation="elu", stream_bf16=False))
    ref_elu = reference_forward(x, params, activation="elu")
    assert jnp.allclose(out_elu, ref_elu, atol=1e-5, rtol=1e-5), "elu mismatch"

    # default path: bf16 streaming of x / weights (f32 accumulation).
    out_bf16 = jax.block_until_ready(
        dense_net_forward(x, params, activation="relu"))
    assert out_bf16.shape == (N, out_dim)
    assert jnp.allclose(out_bf16, ref, atol=5e-2), "bf16 mismatch"

    print("KERNEL_OK")
</pallas_src>

<mosaic_0001>
module attributes {stable_mosaic.version = 11 : i64} {
  func.func @_mlp_kernel(%arg0: i32, %arg1: memref<64x128xf32, #tpu.memory_space<vmem>>, %arg2: memref<128x256xf32, #tpu.memory_space<vmem>>, %arg3: memref<1x256xf32, #tpu.memory_space<vmem>>, %arg4: memref<256x256xf32, #tpu.memory_space<vmem>>, %arg5: memref<1x256xf32, #tpu.memory_space<vmem>>, %arg6: memref<256x64xf32, #tpu.memory_space<vmem>>, %arg7: memref<1x64xf32, #tpu.memory_space<vmem>>, %arg8: memref<64x64xf32, #tpu.memory_space<vmem>>, %arg9: memref<64x64xf32, #tpu.memory_space<vmem>>) attributes {dimension_semantics = [#tpu.dimension_semantics<parallel>], iteration_bounds = array<i64: 2>, scalar_prefetch = 0 : i64, scratch_operands = 0 : i64, tpu.core_type = #tpu.core_type<tc>, window_params = [{transform_indices = @transform_0, window_bounds = array<i64: 64, 128>}, {pipeline_mode = #tpu.pipeline_mode<synchronous>, transform_indices = @transform_1, window_bounds = array<i64: 128, 256>}, {pipeline_mode = #tpu.pipeline_mode<synchronous>, transform_indices = @transform_2, window_bounds = array<i64: 1, 256>}, {pipeline_mode = #tpu.pipeline_mode<synchronous>, transform_indices = @transform_3, window_bounds = array<i64: 256, 256>}, {pipeline_mode = #tpu.pipeline_mode<synchronous>, transform_indices = @transform_4, window_bounds = array<i64: 1, 256>}, {pipeline_mode = #tpu.pipeline_mode<synchronous>, transform_indices = @transform_5, window_bounds = array<i64: 256, 64>}, {pipeline_mode = #tpu.pipeline_mode<synchronous>, transform_indices = @transform_6, window_bounds = array<i64: 1, 64>}, {pipeline_mode = #tpu.pipeline_mode<synchronous>, transform_indices = @transform_7, window_bounds = array<i64: 64, 64>}, {transform_indices = @transform_8, window_bounds = array<i64: 64, 64>}]} {
    %c0 = arith.constant 0 : index
    %c0_0 = arith.constant 0 : index
    %0 = vector.load %arg1[%c0, %c0_0] : memref<64x128xf32, #tpu.memory_space<vmem>>, vector<64x128xf32>
    %c0_1 = arith.constant 0 : index
    %c0_2 = arith.constant 0 : index
    %1 = vector.load %arg2[%c0_1, %c0_2] : memref<128x256xf32, #tpu.memory_space<vmem>>, vector<128x256xf32>
    %cst = arith.constant dense<0.000000e+00> : vector<64x256xf32>
    %2 = tpu.matmul %0, %1, %cst {dimension_numbers = #tpu.dot_dimension_numbers<[1], [0], [0], [1], [0, 0, 1, 1], [], []>} : vector<64x128xf32>, vector<128x256xf32>, vector<64x256xf32> -> vector<64x256xf32>
    %c0_3 = arith.constant 0 : index
    %c0_4 = arith.constant 0 : index
    %3 = vector.load %arg3[%c0_3, %c0_4] : memref<1x256xf32, #tpu.memory_space<vmem>>, vector<1x256xf32>
    %4 = vector.broadcast %3 : vector<1x256xf32> to vector<64x256xf32>
    %5 = arith.addf %2, %4 : vector<64x256xf32>
    %cst_5 = arith.constant 0.000000e+00 : f32
    %6 = vector.broadcast %cst_5 : f32 to vector<64x256xf32>
    %7 = arith.maximumf %5, %6 : vector<64x256xf32>
    %c0_6 = arith.constant 0 : index
    %c0_7 = arith.constant 0 : index
    %8 = vector.load %arg4[%c0_6, %c0_7] : memref<256x256xf32, #tpu.memory_space<vmem>>, vector<256x256xf32>
    %cst_8 = arith.constant dense<0.000000e+00> : vector<64x256xf32>
    %9 = tpu.matmul %7, %8, %cst_8 {dimension_numbers = #tpu.dot_dimension_numbers<[1], [0], [0], [1], [0, 0, 1, 1], [], []>} : vector<64x256xf32>, vector<256x256xf32>, vector<64x256xf32> -> vector<64x256xf32>
    %c0_9 = arith.constant 0 : index
    %c0_10 = arith.constant 0 : index
    %10 = vector.load %arg5[%c0_9, %c0_10] : memref<1x256xf32, #tpu.memory_space<vmem>>, vector<1x256xf32>
    %11 = vector.broadcast %10 : vector<1x256xf32> to vector<64x256xf32>
    %12 = arith.addf %9, %11 : vector<64x256xf32>
    %cst_11 = arith.constant 0.000000e+00 : f32
    %13 = vector.broadcast %cst_11 : f32 to vector<64x256xf32>
    %14 = arith.maximumf %12, %13 : vector<64x256xf32>
    %c0_12 = arith.constant 0 : index
    %c0_13 = arith.constant 0 : index
    %15 = vector.load %arg6[%c0_12, %c0_13] : memref<256x64xf32, #tpu.memory_space<vmem>>, vector<256x64xf32>
    %cst_14 = arith.constant dense<0.000000e+00> : vector<64x64xf32>
    %16 = tpu.matmul %14, %15, %cst_14 {dimension_numbers = #tpu.dot_dimension_numbers<[1], [0], [0], [1], [0, 0, 1, 1], [], []>} : vector<64x256xf32>, vector<256x64xf32>, vector<64x64xf32> -> vector<64x64xf32>
    %c0_15 = arith.constant 0 : index
    %c0_16 = arith.constant 0 : index
    %17 = vector.load %arg7[%c0_15, %c0_16] : memref<1x64xf32, #tpu.memory_space<vmem>>, vector<1x64xf32>
    %18 = vector.broadcast %17 : vector<1x64xf32> to vector<64x64xf32>
    %19 = arith.addf %16, %18 : vector<64x64xf32>
    %cst_17 = arith.constant dense<0xFF800000> : vector<64xf32>
    %20 = vector.multi_reduction <maximumf>, %19, %cst_17 [1] : vector<64x64xf32> to vector<64xf32>
    %21 = vector.shape_cast %20 : vector<64xf32> to vector<64x1xf32>
    %22 = vector.broadcast %21 : vector<64x1xf32> to vector<64x64xf32>
    %23 = arith.subf %19, %22 : vector<64x64xf32>
    %24 = math.exp %23 : vector<64x64xf32>
    %c0_18 = arith.constant 0 : index
    %c0_19 = arith.constant 0 : index
    %25 = vector.load %arg8[%c0_18, %c0_19] : memref<64x64xf32, #tpu.memory_space<vmem>>, vector<64x64xf32>
    %cst_20 = arith.constant dense<0.000000e+00> : vector<64x64xf32>
    %26 = tpu.matmul %24, %25, %cst_20 {dimension_numbers = #tpu.dot_dimension_numbers<[1], [0], [0], [1], [0, 0, 1, 1], [], []>} : vector<64x64xf32>, vector<64x64xf32>, vector<64x64xf32> -> vector<64x64xf32>
    %27 = math.log %26 : vector<64x64xf32>
    %28 = arith.subf %23, %27 : vector<64x64xf32>
    %c0_21 = arith.constant 0 : index
    %c0_22 = arith.constant 0 : index
    %29 = vector.load %arg9[%c0_21, %c0_22] : memref<64x64xf32, #tpu.memory_space<vmem>>, vector<64x64xf32>
    tpu.vector_store %arg9[%c0_21, %c0_22], %28 {strides = array<i32>} : memref<64x64xf32, #tpu.memory_space<vmem>>, vector<64x64xf32>,
    return
  }
  func.func @transform_0(%arg0: i32) -> (i32, i32) {
    %c0_i32 = arith.constant 0 : i32
    %c0_i32_0 = arith.constant 0 : i32
    return %arg0, %c0_i32 : i32, i32
  }
  func.func @transform_1(%arg0: i32) -> (i32, i32) {
    %c0_i32 = arith.constant 0 : i32
    %c0_i32_0 = arith.constant 0 : i32
    %c0_i32_1 = arith.constant 0 : i32
    return %c0_i32, %c0_i32_0 : i32, i32
  }
  func.func @transform_2(%arg0: i32) -> (i32, i32) {
    %c0_i32 = arith.constant 0 : i32
    %c0_i32_0 = arith.constant 0 : i32
    %c0_i32_1 = arith.constant 0 : i32
    return %c0_i32, %c0_i32_0 : i32, i32
  }
  func.func @transform_3(%arg0: i32) -> (i32, i32) {
    %c0_i32 = arith.constant 0 : i32
    %c0_i32_0 = arith.constant 0 : i32
    %c0_i32_1 = arith.constant 0 : i32
    return %c0_i32, %c0_i32_0 : i32, i32
  }
  func.func @transform_4(%arg0: i32) -> (i32, i32) {
    %c0_i32 = arith.constant 0 : i32
    %c0_i32_0 = arith.constant 0 : i32
    %c0_i32_1 = arith.constant 0 : i32
    return %c0_i32, %c0_i32_0 : i32, i32
  }
  func.func @transform_5(%arg0: i32) -> (i32, i32) {
    %c0_i32 = arith.constant 0 : i32
    %c0_i32_0 = arith.constant 0 : i32
    %c0_i32_1 = arith.constant 0 : i32
    return %c0_i32, %c0_i32_0 : i32, i32
  }
  func.func @transform_6(%arg0: i32) -> (i32, i32) {
    %c0_i32 = arith.constant 0 : i32
    %c0_i32_0 = arith.constant 0 : i32
    %c0_i32_1 = arith.constant 0 : i32
    return %c0_i32, %c0_i32_0 : i32, i32
  }
  func.func @transform_7(%arg0: i32) -> (i32, i32) {
    %c0_i32 = arith.constant 0 : i32
    %c0_i32_0 = arith.constant 0 : i32
    %c0_i32_1 = arith.constant 0 : i32
    return %c0_i32, %c0_i32_0 : i32, i32
  }
  func.func @transform_8(%arg0: i32) -> (i32, i32) {
    %c0_i32 = arith.constant 0 : i32
    %c0_i32_0 = arith.constant 0 : i32
    return %arg0, %c0_i32 : i32, i32
  }
}

</mosaic_0001>

<bundles_post_ra>
// kernel: tpu_custom_call.1
= control target key start
LH: loop header
LB: loop body
LE: loop exit
PB: predicated region body
PF: predicated region fallthrough
CT: control target
= control target key end

     0   :  { %13 = vsyncpa [#allocation3], 0  ;;  %s2113_s0 = inlined_call_operand.vmem [shape: f32[128,128], index: 0, kind: input, shape index: {}]   ;;  %s2114_s1 = inlined_call_operand.vmem [shape: f32[128,256], index: 1, kind: input, shape index: {}]   ;;  %s2115_s2 = inlined_call_operand.vmem [shape: f32[1,256], index: 2, kind: input, shape index: {}]   ;;  %s2116_s3 = inlined_call_operand.hbm [shape: f32[256,256], index: 3, kind: input, shape index: {}]   ;;  %s2117_s4 = inlined_call_operand.vmem [shape: f32[1,256], index: 4, kind: input, shape index: {}]   ;;  %s2118_s5 = inlined_call_operand.vmem [shape: f32[256,64], index: 5, kind: input, shape index: {}]   ;;  %s2119_s6 = inlined_call_operand.vmem [shape: f32[1,64], index: 6, kind: input, shape index: {}]   ;;  %s2120_s7 = inlined_call_operand.hbm [shape: f32[64,64], index: 7, kind: input, shape index: {}]   ;;  %s2121_s8 = inlined_call_operand.vmem [shape: f32[128,64], index: 8, kind: output, shape index: {}]  }
   0x1   :  { %14 = vsyncpa [#allocation5], 0  ;;  %s1639_s27 = smov 0  }
   0x2 LB: > { %s1587_s28 = smov [#allocation2]   ;;  %s1165_s30 = sadd.s32 4294967295, %s1585_s27   ;;  %s1585_s27 = sphi %s1639_s27, %s20_s27  }
   0x3   : > { %s242_s29 = sshll.u32 %s1587_s28, 4  ;;  %p1167_p0 = scmp.ge.s32.totalorder %s1585_s27, 1  ;;  %s243_s29 = int_to_ptr.vmem [resolvable:$true] %s242_s29 }
   0x4   : > { %p224_p1 = scmp.lt.s32.totalorder %s1585_s27, 3  ;;  %p1653_p3 = scmp.eq.s32.totalorder %s1165_s30, 0 }
   0x5   : > { %s1588_s11 = smov [#allocation4]   ;;  %s1515_s16 = scalar_lea.hbm %s2116_s3, 8192 }
   0x6   : > { %p1647_p2 = pnand %p1167_p0, %p224_p1  ;;  %s264_s12 = sshll.u32 %s1588_s11, 4  ;;  %s1665_s12 = int_to_ptr.vmem [resolvable:$true] %s264_s12 }
   0x7   : > { %s2126_s10 = scalar_select %p1653_p3, 1, 0 }
   0x8   : > { %s2125_s9 = scalar_select %p1647_p2, 1, 0 }
   0x9   : > { %p1457_p4 = pneg %p1647_p2  ;;  %p1516_p6 = scmp.ne.s32.totalorder %s2116_s3, %s1515_s16 }
   0xa   : > { %p1522_p10 = scmp.lt.u32.totalorder %s1515_s16, %s2116_s3 }
   0xb   : > { %p1661_p5 = pnand %p1653_p3, %p1457_p4 }
   0xd   : > { %p1517_p7 = pneg %p1661_p5 }
   0xf   : > { %p1518_p8 = pnand %p1517_p7, %p1516_p6 }
  0x11   : > { %p1519_p9 = pneg %p1518_p8 }
  0x13   : > { %p1524_p11 = pnand %p1522_p10, %p1519_p9 }
  0x15   : > { %1527 = shalt.err (!%p1524_p11)
}
  0x16   : > { %s1528_s21 = scalar_lea.vmem %s243_s29, 8192  ;;  %p1536_p1 = scmp.lt.s32.totalorder %s243_s29, %s243_s29 }
  0x17   : > { %p1529_p12 = scmp.ne.s32.totalorder %s243_s29, %s1528_s21  ;;  %p1537_p4 = scmp.lt.s32.totalorder %s1528_s21, %s1528_s21 }
  0x19   : > { %p1531_p13 = pnand %p1529_p12, %p1517_p7  ;;  %p1538_p3 = por %p1537_p4, %p1536_p1 }
  0x1b   : > { %p1532_p0 = pneg %p1531_p13 }
  0x1d   : > { %p1539_p2 = pnand %p1538_p3, %p1532_p0 }
  0x1f   : > { %1542 = shalt.err (!%p1539_p2)
}
  0x20   : > { %s1589_s22 = smov 256   ;;  %s1590_s23 = smov 16  }
  0x21   : > { %1460 = dma.hbm_to_vmem [thread:$0]  (!%p1661_p5), %s2116_s3, 8192, %s243_s29, [#allocation3], %s1589_s22, %s1589_s22, %s1590_s23  }
  0x22   : > { %s1543_s11 = scalar_lea.hbm %s2120_s7, 1024 }
  0x23   : > { %p1544_p6 = scmp.ne.s32.totalorder %s2120_s7, %s1543_s11  ;;  %p1550_p8 = scmp.lt.u32.totalorder %s1543_s11, %s2120_s7 }
  0x25   : > { %p1546_p2 = pnand %p1544_p6, %p1517_p7 }
  0x27   : > { %p1547_p3 = pneg %p1546_p2 }
  0x29   : > { %p1552_p9 = pnand %p1550_p8, %p1547_p3 }
  0x2b   : > { %1555 = shalt.err (!%p1552_p9)
}
  0x2c   : > { %s1556_s29 = scalar_lea.vmem %s1665_s12, 1024  ;;  %p1564_p13 = scmp.lt.s32.totalorder %s1665_s12, %s1665_s12 }
  0x2d   : > { %p1557_p10 = scmp.ne.s32.totalorder %s1665_s12, %s1556_s29  ;;  %p1565_p0 = scmp.lt.s32.totalorder %s1556_s29, %s1556_s29 }
  0x2f   : > { %p1559_p11 = pnand %p1557_p10, %p1517_p7  ;;  %p1566_p1 = por %p1565_p0, %p1564_p13 }
  0x31   : > { %p1560_p12 = pneg %p1559_p11 }
  0x33   : > { %p1567_p4 = pnand %p1566_p1, %p1560_p12 }
  0x35   : > { %1570 = shalt.err (!%p1567_p4)
}
  0x36   : > { %s1591_s18 = smov 128   ;;  %s1592_s19 = smov 8  }
  0x37   : > { %1463 = dma.hbm_to_vmem [thread:$0]  (!%p1661_p5), %s2120_s7, 1024, %s1665_s12, [#allocation5], %s1591_s18, %s1591_s18, %s1592_s19  }
  0x38   : > { %p2128_p6 = scmp.ne.s32.totalorder %s2125_s9, 0 }
  0x39   : > { %p2129_p7 = scmp.ne.s32.totalorder (!%p2128_p6), %s2126_s10, 0 }
  0x3a   : > { %289 = sbr.rel (%p2128_p6) target bundleno = 1171 (0x493), region = 52 }
  0x41   : > { %1576 = dma.done.wait (%p2129_p7), [#allocation3], 8192  }
  0x42   : > { %1578 = vsyncadd (%p2129_p7), [#allocation3], 4294959104 }
  0x43   : > { %1580 = dma.done.wait (%p2129_p7), [#allocation5], 1024  }
  0x44   : > { %1582 = vsyncadd (%p2129_p7), [#allocation5], 4294966272  ;;  %v1593_v0 = vmov 0.0   ;;  %v348_v1 = vld [vmem:[%s2114_s1 + $0x8] sm:$0xff]  ;;  %v350_v2 = vld [vmem:[%s2114_s1 + $0x18] sm:$0xff]  ;;  %s1793_s23 = sshll.u32 %s1165_s30, 3 }
  0x45   : > { %455 = vmatprep.mubr.f32.mxu0 %v1593_v0  ;;  %v347_v3 = vld [vmem:[%s2114_s1] sm:$0xff]  ;;  %v1289_v4 = vpack.c.bf16 %v350_v2, %v348_v1  ;;  %v349_v5 = vld [vmem:[%s2114_s1 + $0x10] sm:$0xff]  ;;  %v352_v6 = vld [vmem:[%s2114_s1 + $0x28] sm:$0xff]  ;;  %p328_p5 = scmp.lt.s32.totalorder %s1793_s23, 15  ;;  %vm869_vm0 = vcmask 523264  }
  0x46   : > { %v354_v7 = vld [vmem:[%s2114_s1 + $0x38] sm:$0xff]  ;;  %v1291_v8 = vpack.c.bf16 %v349_v5, %v347_v3  ;;  %v351_v10 = vld [vmem:[%s2114_s1 + $0x20] sm:$0xff]  ;;  %v353_v11 = vld [vmem:[%s2114_s1 + $0x30] sm:$0xff] }
  0x47   : > { %v1293_v9 = vpack.c.bf16 %v354_v7, %v352_v6  ;;  %v356_v12 = vld [vmem:[%s2114_s1 + $0x48] sm:$0xff]  ;;  %1290 = vmatprep.subr.bf16.mxu0 %v1289_v4  ;;  %v358_v13 = vld [vmem:[%s2114_s1 + $0x58] sm:$0xff]  ;;  %v1295_v14 = vpack.c.bf16 %v353_v11, %v351_v10  ;;  %v355_v16 = vld [vmem:[%s2114_s1 + $0x40] sm:$0xff]  ;;  %s2131_s23 = smov (!%p328_p5, %s1793_s23), 15 }
  0x48   : > { %1292 = vmatpush1.bf16.msra.mxu0 %v1291_v8  ;;  %v1297_v15 = vpack.c.bf16 %v358_v13, %v356_v12  ;;  %v357_v17 = vld [vmem:[%s2114_s1 + $0x50] sm:$0xff]  ;;  %v360_v18 = vld [vmem:[%s2114_s1 + $0x68] sm:$0xff]  ;;  %v362_v19 = vld [vmem:[%s2114_s1 + $0x78] sm:$0xff]  ;;  %s1175_s24 = sshll.u32 %s2131_s23, 3 }
  0x49   : > { %1294 = vmatprep.subr.bf16.mxu0 %v1293_v9  ;;  %v1299_v20 = vpack.c.bf16 %v357_v17, %v355_v16  ;;  %v1301_v21 = vpack.c.bf16 %v362_v19, %v360_v18  ;;  %v359_v22 = vld [vmem:[%s2114_s1 + $0x60] sm:$0xff]  ;;  %v361_v23 = vld [vmem:[%s2114_s1 + $0x70] sm:$0xff]  ;;  %v364_v24 = vld [vmem:[%s2114_s1 + $0x88] sm:$0xff]  ;;  %s1837_s30 = scalar_lea.vmem %s2113_s0, %s1175_s24  ;;  %s2086_s22 = scalar_lea.vmem %s2121_s8, %s1175_s24 }
  0x4a   : > { %v366_v25 = vld [vmem:[%s2114_s1 + $0x98] sm:$0xff]  ;;  %v1303_v26 = vpack.c.bf16 %v361_v23, %v359_v22  ;;  %v363_v27 = vld [vmem:[%s2114_s1 + $0x80] sm:$0xff]  ;;  %v365_v28 = vld [vmem:[%s2114_s1 + $0x90] sm:$0xff] }
  0x4b   : > { %v368_v29 = vld [vmem:[%s2114_s1 + $0xa8] sm:$0xff]  ;;  %v1305_v30 = vpack.c.bf16 %v366_v25, %v364_v24  ;;  %v370_v31 = vld [vmem:[%s2114_s1 + $0xb8] sm:$0xff]  ;;  %v520_v35 = vld [vmem:[#allocation2] sm:$0xff]  ;;  %v1307_v42 = vpack.c.bf16 %v365_v28, %v363_v27 }
  0x4c   : > { %1296 = vmatpush1.bf16.msra.mxu0 %v1295_v14  ;;  %v521_v32 = vld [vmem:[#allocation2 + $0x8] sm:$0xff]  ;;  %v523_v33 = vld [vmem:[#allocation2 + $0x18] sm:$0xff]  ;;  %v522_v36 = vld [vmem:[#allocation2 + $0x10] sm:$0xff]  ;;  %v1309_v46 = vpack.c.bf16 %v370_v31, %v368_v29 }
  0x4d   : > { %1298 = vmatprep.subr.bf16.mxu0 %v1297_v15  ;;  %v1321_v34 = vpack.c.bf16 %v523_v33, %v521_v32  ;;  %v525_v37 = vld [vmem:[#allocation2 + $0x28] sm:$0xff]  ;;  %v1323_v38 = vpack.c.bf16 %v522_v36, %v520_v35  ;;  %v527_v39 = vld [vmem:[#allocation2 + $0x38] sm:$0xff]  ;;  %v524_v40 = vld [vmem:[#allocation2 + $0x20] sm:$0xff] }
  0x4e   : > { %v526_v41 = vld [vmem:[#allocation2 + $0x30] sm:$0xff]  ;;  %v1325_v43 = vpack.c.bf16 %v527_v39, %v525_v37  ;;  %v529_v44 = vld [vmem:[#allocation2 + $0x48] sm:$0xff]  ;;  %v531_v45 = vld [vmem:[#allocation2 + $0x58] sm:$0xff] }
  0x4f   : > { %1322 = vmatprep.subr.bf16.mxu1 %v1321_v34  ;;  %v367_v47 = vld [vmem:[%s2114_s1 + $0xa0] sm:$0xff]  ;;  %v369_v48 = vld [vmem:[%s2114_s1 + $0xb0] sm:$0xff]  ;;  %v372_v49 = vld [vmem:[%s2114_s1 + $0xc8] sm:$0xff]  ;;  %v1327_v50 = vpack.c.bf16 %v526_v41, %v524_v40  ;;  %v1329_v52 = vpack.c.bf16 %v531_v45, %v529_v44 }
  0x50   : > { %1300 = vmatpush1.bf16.msra.mxu0 %v1299_v20  ;;  %1324 = vmatpush1.bf16.msra.mxu1 %v1323_v38  ;;  %v374_v51 = vld [vmem:[%s2114_s1 + $0xd8] sm:$0xff]  ;;  %v528_v53 = vld [vmem:[#allocation2 + $0x40] sm:$0xff]  ;;  %v530_v54 = vld [vmem:[#allocation2 + $0x50] sm:$0xff]  ;;  %v1311_v57 = vpack.c.bf16 %v369_v48, %v367_v47 }
  0x51   : > { %1302 = vmatprep.subr.bf16.mxu0 %v1301_v21  ;;  %1326 = vmatprep.subr.bf16.mxu1 %v1325_v43  ;;  %v533_v55 = vld [vmem:[#allocation2 + $0x68] sm:$0xff]  ;;  %v535_v56 = vld [vmem:[#allocation2 + $0x78] sm:$0xff]  ;;  %v1313_v58 = vpack.c.bf16 %v374_v51, %v372_v49  ;;  %v371_v59 = vld [vmem:[%s2114_s1 + $0xc0] sm:$0xff]  ;;  %v1331_v62 = vpack.c.bf16 %v530_v54, %v528_v53 }
  0x52   : > { %v373_v60 = vld [vmem:[%s2114_s1 + $0xd0] sm:$0xff]  ;;  %v376_v61 = vld [vmem:[%s2114_s1 + $0xe8] sm:$0xff]  ;;  %v378_v63 = vld [vmem:[%s2114_s1 + $0xf8] sm:$0xff]  ;;  %v1333_v1 = vpack.c.bf16 %v535_v56, %v533_v55 }
  0x53   : > { %v532_v2 = vld [vmem:[#allocation2 + $0x60] sm:$0xff]  ;;  %v534_v3 = vld [vmem:[#allocation2 + $0x70] sm:$0xff]  ;;  %v537_v4 = vld [vmem:[#allocation2 + $0x88] sm:$0xff]  ;;  %v1315_v6 = vpack.c.bf16 %v373_v60, %v371_v59  ;;  %v1317_v7 = vpack.c.bf16 %v378_v63, %v376_v61 }
  0x54   : > { %1304 = vmatpush1.bf16.msra.mxu0 %v1303_v26  ;;  %1328 = vmatpush1.bf16.msra.mxu1 %v1327_v50  ;;  %v539_v5 = vld [vmem:[#allocation2 + $0x98] sm:$0xff]  ;;  %v375_v8 = vld [vmem:[%s2114_s1 + $0xe0] sm:$0xff]  ;;  %v377_v9 = vld [vmem:[%s2114_s1 + $0xf0] sm:$0xff]  ;;  %v1335_v10 = vpack.c.bf16 %v534_v3, %v532_v2 }
  0x55   : > { %1306 = vmatprep.subr.bf16.mxu0 %v1305_v30  ;;  %1330 = vmatprep.subr.bf16.mxu1 %v1329_v52  ;;  %v1337_v11 = vpack.c.bf16 %v539_v5, %v537_v4  ;;  %v536_v12 = vld [vmem:[#allocation2 + $0x80] sm:$0xff]  ;;  %v538_v13 = vld [vmem:[#allocation2 + $0x90] sm:$0xff]  ;;  %v541_v14 = vld [vmem:[#allocation2 + $0xa8] sm:$0xff]  ;;  %v1319_v16 = vpack.c.bf16 %v377_v9, %v375_v8 }
  0x56   : > { %v543_v15 = vld [vmem:[#allocation2 + $0xb8] sm:$0xff]  ;;  %v1339_v17 = vpack.c.bf16 %v538_v13, %v536_v12  ;;  %v540_v19 = vld [vmem:[#allocation2 + $0xa0] sm:$0xff]  ;;  %v542_v20 = vld [vmem:[#allocation2 + $0xb0] sm:$0xff] }
  0x57   : > { %v1341_v18 = vpack.c.bf16 %v543_v15, %v541_v14  ;;  %v545_v21 = vld [vmem:[#allocation2 + $0xc8] sm:$0xff]  ;;  %v547_v22 = vld [vmem:[#allocation2 + $0xd8] sm:$0xff]  ;;  %v339_v23 = vld [vmem:[%s1837_s30] sm:$0xff]  ;;  %v1343_v24 = vpack.c.bf16 %v542_v20, %v540_v19 }
  0x58   : > { %1308 = vmatpush1.bf16.msra.mxu0 %v1307_v42  ;;  %1332 = vmatpush1.bf16.msra.mxu1 %v1331_v62  ;;  %v1345_v25 = vpack.c.bf16 %v547_v22, %v545_v21  ;;  %v544_v26 = vld [vmem:[#allocation2 + $0xc0] sm:$0xff]  ;;  %v546_v27 = vld [vmem:[#allocation2 + $0xd0] sm:$0xff]  ;;  %v549_v28 = vld [vmem:[#allocation2 + $0xe8] sm:$0xff] }
  0x59   : > { %1310 = vmatprep.subr.bf16.mxu0 %v1309_v46  ;;  %1334 = vmatprep.subr.bf16.mxu1 %v1333_v1  ;;  %v551_v29 = vld [vmem:[#allocation2 + $0xf8] sm:$0xff]  ;;  %v340_v30 = vld [vmem:[%s1837_s30 + $0x8] sm:$0xff]  ;;  %v1347_v31 = vpack.c.bf16 %v546_v27, %v544_v26  ;;  %v548_v33 = vld [vmem:[#allocation2 + $0xe0] sm:$0xff] }
  0x5a   : > { %v1349_v32 = vpack.c.bf16 %v551_v29, %v549_v28  ;;  %v550_v34 = vld [vmem:[#allocation2 + $0xf0] sm:$0xff]  ;;  %v553_v35 = vld [vmem:[#allocation2 + $0x108] sm:$0xff]  ;;  %v555_v36 = vld [vmem:[#allocation2 + $0x118] sm:$0xff] }
  0x5b   : > { %v341_v37 = vld [vmem:[%s1837_s30 + $0x10] sm:$0xff]  ;;  %v1351_v38 = vpack.c.bf16 %v550_v34, %v548_v33  ;;  %v1353_v39 = vpack.c.bf16 %v555_v36, %v553_v35  ;;  %v552_v40 = vld [vmem:[#allocation2 + $0x100] sm:$0xff]  ;;  %v557_v42 = vld [vmem:[#allocation2 + $0x128] sm:$0xff] }
  0x5c   : > { %1312 = vmatpush1.bf16.msra.mxu0 %v1311_v57  ;;  %1336 = vmatpush1.bf16.msra.mxu1 %v1335_v10  ;;  %v554_v41 = vld [vmem:[#allocation2 + $0x110] sm:$0xff]  ;;  %v559_v43 = vld [vmem:[#allocation2 + $0x138] sm:$0xff]  ;;  %v556_v47 = vld [vmem:[#allocation2 + $0x120] sm:$0xff] }
  0x5d   : > { %1314 = vmatprep.subr.bf16.mxu0 %v1313_v58  ;;  %1338 = vmatprep.subr.bf16.mxu1 %v1337_v11  ;;  %v342_v44 = vld [vmem:[%s1837_s30 + $0x18] sm:$0xff]  ;;  %v1355_v45 = vpack.c.bf16 %v554_v41, %v552_v40  ;;  %v1357_v46 = vpack.c.bf16 %v559_v43, %v557_v42  ;;  %v558_v48 = vld [vmem:[#allocation2 + $0x130] sm:$0xff]  ;;  %v561_v49 = vld [vmem:[#allocation2 + $0x148] sm:$0xff] }
  0x5e   : > { %v563_v50 = vld [vmem:[#allocation2 + $0x158] sm:$0xff]  ;;  %v343_v51 = vld [vmem:[%s1837_s30 + $0x20] sm:$0xff]  ;;  %v1359_v52 = vpack.c.bf16 %v558_v48, %v556_v47  ;;  %v562_v55 = vld [vmem:[#allocation2 + $0x150] sm:$0xff] }
  0x5f   : > { %v1361_v53 = vpack.c.bf16 %v563_v50, %v561_v49  ;;  %v560_v54 = vld [vmem:[#allocation2 + $0x140] sm:$0xff]  ;;  %v565_v56 = vld [vmem:[#allocation2 + $0x168] sm:$0xff]  ;;  %v567_v57 = vld [vmem:[#allocation2 + $0x178] sm:$0xff] }
  0x60   : > { %1316 = vmatpush1.bf16.msra.mxu0 %v1315_v6  ;;  %1340 = vmatpush1.bf16.msra.mxu1 %v1339_v17  ;;  %v344_v58 = vld [vmem:[%s1837_s30 + $0x28] sm:$0xff]  ;;  %v1363_v59 = vpack.c.bf16 %v562_v55, %v560_v54  ;;  %v1365_v60 = vpack.c.bf16 %v567_v57, %v565_v56  ;;  %v564_v61 = vld [vmem:[#allocation2 + $0x160] sm:$0xff]  ;;  %v566_v62 = vld [vmem:[#allocation2 + $0x170] sm:$0xff] }
  0x61   : > { %1318 = vmatprep.subr.bf16.mxu0 %v1317_v7  ;;  %1342 = vmatprep.subr.bf16.mxu1 %v1341_v18  ;;  %v569_v63 = vld [vmem:[#allocation2 + $0x188] sm:$0xff]  ;;  %v571_v1 = vld [vmem:[#allocation2 + $0x198] sm:$0xff]  ;;  %v345_v2 = vld [vmem:[%s1837_s30 + $0x30] sm:$0xff]  ;;  %v1367_v3 = vpack.c.bf16 %v566_v62, %v564_v61 }
  0x62   : > { %v1369_v4 = vpack.c.bf16 %v571_v1, %v569_v63  ;;  %v568_v5 = vld [vmem:[#allocation2 + $0x180] sm:$0xff]  ;;  %v570_v6 = vld [vmem:[#allocation2 + $0x190] sm:$0xff]  ;;  %v573_v7 = vld [vmem:[#allocation2 + $0x1a8] sm:$0xff] }
  0x63   : > { %v575_v8 = vld [vmem:[#allocation2 + $0x1b8] sm:$0xff]  ;;  %v1371_v10 = vpack.c.bf16 %v570_v6, %v568_v5  ;;  %v572_v12 = vld [vmem:[#allocation2 + $0x1a0] sm:$0xff]  ;;  %v574_v13 = vld [vmem:[#allocation2 + $0x1b0] sm:$0xff] }
  0x64   : > { %1320 = vmatpush1.bf16.msra.mxu0 %v1319_v16  ;;  %1344 = vmatpush1.bf16.msra.mxu1 %v1343_v24  ;;  %v346_v9 = vld [vmem:[%s1837_s30 + $0x38] sm:$0xff]  ;;  %v1373_v11 = vpack.c.bf16 %v575_v8, %v573_v7  ;;  %v577_v14 = vld [vmem:[#allocation2 + $0x1c8] sm:$0xff]  ;;  %v1375_v16 = vpack.c.bf16 %v574_v13, %v572_v12  ;;  %v576_v18 = vld [vmem:[#allocation2 + $0x1c0] sm:$0xff] }
  0x65   : > { %1346 = vmatprep.subr.bf16.mxu1 %v1345_v25  ;;  %v579_v15 = vld [vmem:[#allocation2 + $0x1d8] sm:$0xff]  ;;  %v578_v19 = vld [vmem:[#allocation2 + $0x1d0] sm:$0xff]  ;;  %v741_v26 = vld [vmem:[%s2118_s5 + $0x80] sm:$0xff] }
  0x66   : > { %v1377_v17 = vpack.c.bf16 %v579_v15, %v577_v14  ;;  %v1379_v20 = vpack.c.bf16 %v578_v19, %v576_v18  ;;  %v583_v21 = vld [vmem:[#allocation2 + $0x1f8] sm:$0xff]  ;;  %v582_v24 = vld [vmem:[#allocation2 + $0x1f0] sm:$0xff]  ;;  %v742_v27 = vld [vmem:[%s2118_s5 + $0x88] sm:$0xff] }
  0x67   : > { %456 = vmatmul.mubr.f32.vlgmr.msra.gmra.mrb[0].mxu0 %v339_v23  ;;  %v580_v23 = vld [vmem:[#allocation2 + $0x1e0] sm:$0xff]  ;;  %v1385_v29 = vpack.c.bf16 %v742_v27, %v741_v26  ;;  %v727_v35 = vld [vmem:[%s2118_s5 + $0x10] sm:$0xff]  ;;  %v728_v36 = vld [vmem:[%s2118_s5 + $0x18] sm:$0xff] }
  0x68   : > { %461 = vmatprep.mubr.f32.mxu0 %v1593_v0  ;;  %1348 = vmatpush1.bf16.msra.mxu1 %v1347_v31  ;;  %v1383_v25 = vpack.c.bf16 %v582_v24, %v580_v23  ;;  %v725_v28 = vld [vmem:[%s2118_s5] sm:$0xff]  ;;  %v743_v31 = vld [vmem:[%s2118_s5 + $0x90] sm:$0xff]  ;;  %v730_v42 = vld [vmem:[%s2118_s5 + $0x28] sm:$0xff] }
  0x69   : > { %1350 = vmatprep.subr.bf16.mxu1 %v1349_v32  ;;  %v744_v32 = vld [vmem:[%s2118_s5 + $0x98] sm:$0xff]  ;;  %1386 = vmatprep.subr.bf16.mxu0 %v1385_v29  ;;  %v729_v41 = vld [vmem:[%s2118_s5 + $0x20] sm:$0xff]  ;;  %v747_v43 = vld [vmem:[%s2118_s5 + $0xb0] sm:$0xff] }
  0x6a   : > { %v1874_v34 = vpack.c.bf16 %v744_v32, %v743_v31  ;;  %v731_v47 = vld [vmem:[%s2118_s5 + $0x30] sm:$0xff]  ;;  %v732_v48 = vld [vmem:[%s2118_s5 + $0x38] sm:$0xff]  ;;  %v749_v49 = vld [vmem:[%s2118_s5 + $0xc0] sm:$0xff] }
  0x6b   : > { %462 = vmatmul.mubr.f32.gmra.mrb[2].mxu0 %v340_v30  ;;  %v726_v30 = vld [vmem:[%s2118_s5 + $0x8] sm:$0xff]  ;;  %v751_v55 = vld [vmem:[%s2118_s5 + $0xd0] sm:$0xff]  ;;  %v752_v56 = vld [vmem:[%s2118_s5 + $0xd8] sm:$0xff] }
  0x6c   : > { %467 = vmatprep.mubr.f32.mxu0 %v1593_v0  ;;  %1352 = vmatpush1.bf16.msra.mxu1 %v1351_v38  ;;  %v1872_v33 = vpack.c.bf16 %v726_v30, %v725_v28  ;;  %v746_v38 = vld [vmem:[%s2118_s5 + $0xa8] sm:$0xff]  ;;  %v753_v61 = vld [vmem:[%s2118_s5 + $0xe0] sm:$0xff] }
  0x6d   : > { %1354 = vmatprep.subr.bf16.mxu1 %v1353_v39  ;;  %v1889_v39 = vpack.c.bf16 %v728_v36, %v727_v35  ;;  %v750_v50 = vld [vmem:[%s2118_s5 + $0xc8] sm:$0xff]  ;;  %v379_v5 = vld [vmem:[%s2115_s2] sm:$0x3] }
  0x6e   : > { %1388 = vmatpush3.bf16.msra.mxu0 %v1872_v33  ;;  %v734_v54 = vld [vmem:[%s2118_s5 + $0x48] sm:$0xff] }
  0x6f   : > { %468 = vmatmul.mubr.f32.gmra.mrb[4].mxu0 %v341_v37  ;;  %v745_v37 = vld [vmem:[%s2118_s5 + $0xa0] sm:$0xff]  ;;  %1390 = vmatprep.subr.bf16.mxu0 %v1874_v34  ;;  %v754_v62 = vld [vmem:[%s2118_s5 + $0xe8] sm:$0xff] }
  0x70   : > { %473 = vmatprep.mubr.f32.mxu0 %v1593_v0  ;;  %1356 = vmatpush1.bf16.msra.mxu1 %v1355_v45  ;;  %v1892_v40 = vpack.c.bf16 %v746_v38, %v745_v37  ;;  %v1907_v45 = vpack.c.bf16 %v730_v42, %v729_v41  ;;  %v1964_v1 = vpack.c.bf16 %v754_v62, %v753_v61  ;;  %v739_v62 = vld [vmem:[%s2118_s5 + $0x70] sm:$0xff] }
  0x71   : > { %1358 = vmatprep.subr.bf16.mxu1 %v1357_v46 }
  0x72   : > { %1392 = vmatpush3.bf16.msra.mxu0 %v1889_v39 }
  0x73   : > { %474 = vmatmul.mubr.f32.gmra.mrb[6].mxu0 %v342_v44  ;;  %v748_v44 = vld [vmem:[%s2118_s5 + $0xb8] sm:$0xff]  ;;  %1394 = vmatprep.subr.bf16.mxu0 %v1892_v40 }
  0x74   : > { %479 = vmatprep.mubr.f32.mxu0 %v1593_v0  ;;  %1360 = vmatpush1.bf16.msra.mxu1 %v1359_v52  ;;  %v1910_v46 = vpack.c.bf16 %v748_v44, %v747_v43  ;;  %v1928_v52 = vpack.c.bf16 %v750_v50, %v749_v49 }
  0x75   : > { %1362 = vmatprep.subr.bf16.mxu1 %v1361_v53  ;;  %v733_v53 = vld [vmem:[%s2118_s5 + $0x40] sm:$0xff] }
  0x76   : > { %1396 = vmatpush3.bf16.msra.mxu0 %v1907_v45  ;;  %v1943_v57 = vpack.c.bf16 %v734_v54, %v733_v53 }
  0x77   : > { %480 = vmatmul.mubr.f32.gmra.mrb[8].mxu0 %v343_v51  ;;  %v1925_v51 = vpack.c.bf16 %v732_v48, %v731_v47  ;;  %1398 = vmatprep.subr.bf16.mxu0 %v1910_v46 }
  0x78   : > { %485 = vmatprep.mubr.f32.mxu0 %v1593_v0  ;;  %1364 = vmatpush1.bf16.msra.mxu1 %v1363_v59  ;;  %v735_v59 = vld [vmem:[%s2118_s5 + $0x50] sm:$0xff] }
  0x79   : > { %1366 = vmatprep.subr.bf16.mxu1 %v1365_v60  ;;  %v736_v60 = vld [vmem:[%s2118_s5 + $0x58] sm:$0xff] }
  0x7a   : > { %1400 = vmatpush3.bf16.msra.mxu0 %v1925_v51  ;;  %v1961_v63 = vpack.c.bf16 %v736_v60, %v735_v59  ;;  %v755_v59 = vld [vmem:[%s2118_s5 + $0xf0] sm:$0xff]  ;;  %v756_v60 = vld [vmem:[%s2118_s5 + $0xf8] sm:$0xff] }
  0x7b   : > { %486 = vmatmul.mubr.f32.gmra.mrb[10].mxu0 %v344_v58  ;;  %1402 = vmatprep.subr.bf16.mxu0 %v1928_v52  ;;  %v1946_v58 = vpack.c.bf16 %v752_v56, %v751_v55  ;;  %v737_v56 = vld [vmem:[%s2118_s5 + $0x60] sm:$0xff]  ;;  %v1413_v61 = vpack.c.bf16 %v756_v60, %v755_v59 }
  0x7c   : > { %491 = vmatprep.mubr.f32.mxu0 %v1593_v0  ;;  %1368 = vmatpush1.bf16.msra.mxu1 %v1367_v3 }
  0x7d   : > { %1370 = vmatprep.subr.bf16.mxu1 %v1369_v4 }
  0x7e   : > { %1404 = vmatpush3.bf16.msra.mxu0 %v1943_v57 }
  0x7f   : > { %492 = vmatmul.mubr.f32.gmra.mrb[12].mxu0 %v345_v2  ;;  %1406 = vmatprep.subr.bf16.mxu0 %v1946_v58  ;;  %v381_v2 = vlaneseq }
  0x80   : > { %497 = vmatprep.mubr.f32.mxu0 %v1593_v0  ;;  %1372 = vmatpush1.bf16.msra.mxu1 %v1371_v10  ;;  %v581_v0 = vld [vmem:[#allocation2 + $0x1e8] sm:$0xff] }
  0x81   : > { %1374 = vmatprep.subr.bf16.mxu1 %v1373_v11  ;;  %v1381_v22 = vpack.c.bf16 %v583_v21, %v581_v0  ;;  %v1968_v3 = vshrl.u32 %v381_v2, 7  ;;  %v584_v2 = vld [vmem:[%s2117_s4] sm:$0x3] }
  0x82   : > { %1408 = vmatpush3.bf16.msra.mxu0 %v1961_v63 }
  0x83   : > { %498 = vmatmul.mubr.f32.gmra.mrb[14].mxu0 %v346_v9  ;;  %1410 = vmatprep.subr.bf16.mxu0 %v1964_v1  ;;  %v383_v4 = vsub.s32 0, %v1968_v3  ;;  %v387_v6 = vsub.s32 1, %v1968_v3 }
  0x84   : > { %1376 = vmatpush1.bf16.msra.mxu1 %v1375_v16 }
  0x85   : > { %1378 = vmatprep.subr.bf16.mxu1 %v1377_v17  ;;  %v1977_v7 = vrot.slane %v379_v5, %v383_v4  ;;  %v1981_v8 = vrot.slane %v379_v5, %v387_v6  ;;  %v589_v5 = vrot.slane %v584_v2, %v383_v4 }
  0x88   : > { %1380 = vmatpush1.bf16.msra.mxu1 %v1379_v20 }
  0x89   : > { %1382 = vmatprep.subr.bf16.mxu1 %v1381_v22 }
  0x8c   : > { %1384 = vmatpush1.bf16.msra.mxu1 %v1383_v25 }
  0x8d   : > { %1433 = vmatprep.subr.bf16.mxu1 %v1385_v29 }
 0x13a   : > { %v457_v9 = vpop.f32.mrb[0].mxu0 }
 0x13b   : > { %v458_v10 = vadd.f32 %v457_v9, %v1977_v7  ;;  %v459_v11 = vpop.f32.mrb[1].mxu0 }
 0x13c   : > { %v460_v12 = vadd.f32 %v459_v11, %v1981_v8 }
 0x13d   : > { %v504_v15 = vmax.f32 %v458_v10, 0.0 }
 0x13e   : > { %v463_v13 = vpop.f32.mrb[2].mxu0  ;;  %v505_v14 = vmax.f32 %v460_v12, 0.0 }
 0x13f   : > { %v464_v16 = vadd.f32 %v463_v13, %v1977_v7  ;;  %v465_v17 = vpop.f32.mrb[3].mxu0 }
 0x140   : > { %v466_v18 = vadd.f32 %v465_v17, %v1981_v8  ;;  %660 = vmatprep.mubr.f32.mxu1 %v505_v14 }
 0x141   : > { %661 = vmatmul.mubr.f32.vlgmr.msra.gmra.mrb[0].mxu1 %v504_v15  ;;  %v506_v0 = vmax.f32 %v464_v16, 0.0 }
 0x142   : > { %v507_v19 = vmax.f32 %v466_v18, 0.0  ;;  %v469_v20 = vpop.f32.mrb[4].mxu0  ;;  %1441 = vmatpush3.bf16.msra.mxu1 %v1872_v33 }
 0x143   : > { %v470_v21 = vadd.f32 %v469_v20, %v1977_v7  ;;  %v471_v22 = vpop.f32.mrb[5].mxu0  ;;  %1434 = vmatprep.subr.bf16.mxu1 %v1874_v34 }
 0x144   : > { %v472_v23 = vadd.f32 %v471_v22, %v1981_v8  ;;  %666 = vmatprep.mubr.f32.mxu1 %v507_v19 }
 0x145   : > { %667 = vmatmul.mubr.f32.gmra.mrb[2].mxu1 %v506_v0  ;;  %v508_v26 = vmax.f32 %v470_v21, 0.0 }
 0x146   : > { %v509_v24 = vmax.f32 %v472_v23, 0.0  ;;  %v475_v25 = vpop.f32.mrb[6].mxu0  ;;  %1442 = vmatpush3.bf16.msra.mxu1 %v1889_v39 }
 0x147   : > { %v476_v27 = vadd.f32 %v475_v25, %v1977_v7  ;;  %v477_v28 = vpop.f32.mrb[7].mxu0  ;;  %1435 = vmatprep.subr.bf16.mxu1 %v1892_v40 }
 0x148   : > { %v478_v29 = vadd.f32 %v477_v28, %v1981_v8  ;;  %672 = vmatprep.mubr.f32.mxu1 %v509_v24 }
 0x149   : > { %673 = vmatmul.mubr.f32.gmra.mrb[4].mxu1 %v508_v26  ;;  %v510_v32 = vmax.f32 %v476_v27, 0.0 }
 0x14a   : > { %v511_v30 = vmax.f32 %v478_v29, 0.0  ;;  %v481_v31 = vpop.f32.mrb[8].mxu0  ;;  %1443 = vmatpush3.bf16.msra.mxu1 %v1907_v45 }
 0x14b   : > { %v482_v33 = vadd.f32 %v481_v31, %v1977_v7  ;;  %v483_v34 = vpop.f32.mrb[9].mxu0  ;;  %1436 = vmatprep.subr.bf16.mxu1 %v1910_v46 }
 0x14c   : > { %v484_v35 = vadd.f32 %v483_v34, %v1981_v8  ;;  %678 = vmatprep.mubr.f32.mxu1 %v511_v30 }
 0x14d   : > { %679 = vmatmul.mubr.f32.gmra.mrb[6].mxu1 %v510_v32  ;;  %v512_v38 = vmax.f32 %v482_v33, 0.0 }
 0x14e   : > { %v513_v36 = vmax.f32 %v484_v35, 0.0  ;;  %v487_v37 = vpop.f32.mrb[10].mxu0  ;;  %1444 = vmatpush3.bf16.msra.mxu1 %v1925_v51 }
 0x14f   : > { %v488_v39 = vadd.f32 %v487_v37, %v1977_v7  ;;  %v489_v40 = vpop.f32.mrb[11].mxu0  ;;  %1437 = vmatprep.subr.bf16.mxu1 %v1928_v52 }
 0x150   : > { %v490_v41 = vadd.f32 %v489_v40, %v1981_v8  ;;  %684 = vmatprep.mubr.f32.mxu1 %v513_v36 }
 0x151   : > { %685 = vmatmul.mubr.f32.gmra.mrb[8].mxu1 %v512_v38  ;;  %v514_v44 = vmax.f32 %v488_v39, 0.0 }
 0x152   : > { %v515_v42 = vmax.f32 %v490_v41, 0.0  ;;  %v493_v43 = vpop.f32.mrb[12].mxu0  ;;  %1445 = vmatpush3.bf16.msra.mxu1 %v1943_v57  ;;  %v738_v57 = vld [vmem:[%s2118_s5 + $0x68] sm:$0xff] }
 0x153   : > { %v494_v45 = vadd.f32 %v493_v43, %v1977_v7  ;;  %v495_v46 = vpop.f32.mrb[13].mxu0  ;;  %1438 = vmatprep.subr.bf16.mxu1 %v1946_v58  ;;  %v1411_v58 = vpack.c.bf16 %v738_v57, %v737_v56 }
 0x154   : > { %v496_v47 = vadd.f32 %v495_v46, %v1981_v8  ;;  %690 = vmatprep.mubr.f32.mxu1 %v515_v42 }
 0x155   : > { %691 = vmatmul.mubr.f32.gmra.mrb[10].mxu1 %v514_v44  ;;  %v516_v50 = vmax.f32 %v494_v45, 0.0  ;;  %1412 = vmatpush3.bf16.msra.mxu0 %v1411_v58 }
 0x156   : > { %v517_v48 = vmax.f32 %v496_v47, 0.0  ;;  %v499_v49 = vpop.f32.mrb[14].mxu0  ;;  %1446 = vmatpush3.bf16.msra.mxu1 %v1961_v63  ;;  %v740_v63 = vld [vmem:[%s2118_s5 + $0x78] sm:$0xff]  ;;  %1414 = vmatprep.subr.bf16.mxu0 %v1413_v61 }
 0x157   : > { %v500_v51 = vadd.f32 %v499_v49, %v1977_v7  ;;  %v501_v52 = vpop.f32.mrb[15].mxu0  ;;  %1439 = vmatprep.subr.bf16.mxu1 %v1964_v1  ;;  %v1415_v1 = vpack.c.bf16 %v740_v63, %v739_v62  ;;  %v593_v7 = vrot.slane %v584_v2, %v387_v6 }
 0x158   : > { %v502_v53 = vadd.f32 %v501_v52, %v1981_v8  ;;  %696 = vmatprep.mubr.f32.mxu1 %v517_v48 }
 0x159   : > { %697 = vmatmul.mubr.f32.gmra.mrb[12].mxu1 %v516_v50  ;;  %v518_v55 = vmax.f32 %v500_v51, 0.0  ;;  %1416 = vmatpush3.bf16.msra.mxu0 %v1415_v1 }
 0x15a   : > { %v519_v54 = vmax.f32 %v502_v53, 0.0  ;;  %1447 = vmatpush3.bf16.msra.mxu1 %v1411_v58 }
 0x15b   : > { %1440 = vmatprep.subr.bf16.mxu1 %v1413_v61 }
 0x15c   : > { %702 = vmatprep.mubr.f32.mxu1 %v519_v54  ;;  %v1178_v54 = vld [vmem:[%s2119_s6] ss:$0 sm:$0xff] }
 0x15d   : > { %703 = vmatmul.mubr.f32.gmra.mrb[14].mxu1 %v518_v55 }
 0x15e   : > { %1448 = vmatpush3.bf16.msra.mxu1 %v1415_v1 }
 0x214   : > { %v662_v8 = vpop.f32.mrb[0].mxu1 }
 0x215   : > { %v663_v9 = vadd.f32 %v662_v8, %v589_v5  ;;  %v664_v10 = vpop.f32.mrb[1].mxu1 }
 0x216   : > { %v665_v11 = vadd.f32 %v664_v10, %v593_v7 }
 0x217   : > { %v709_v14 = vmax.f32 %v663_v9, 0.0 }
 0x218   : > { %v710_v12 = vmax.f32 %v665_v11, 0.0  ;;  %v668_v13 = vpop.f32.mrb[2].mxu1 }
 0x219   : > { %v669_v15 = vadd.f32 %v668_v13, %v589_v5  ;;  %v670_v16 = vpop.f32.mrb[3].mxu1 }
 0x21a   : > { %v671_v17 = vadd.f32 %v670_v16, %v593_v7  ;;  %828 = vmatprep.mubr.f32.mxu0 %v710_v12 }
 0x21b   : > { %829 = vmatmul.mubr.f32.vlgmr.msra.gmra.mrb[16].mxu0 %v709_v14  ;;  %v711_v20 = vmax.f32 %v669_v15, 0.0 }
 0x21c   : > { %v712_v18 = vmax.f32 %v671_v17, 0.0  ;;  %v674_v19 = vpop.f32.mrb[4].mxu1 }
 0x21d   : > { %v675_v0 = vadd.f32 %v674_v19, %v589_v5  ;;  %v676_v4 = vpop.f32.mrb[5].mxu1  ;;  %v918_v19 = vld [vmem:[#allocation4] sm:$0xff] }
 0x21e   : > { %v677_v21 = vadd.f32 %v676_v4, %v593_v7  ;;  %833 = vmatprep.mubr.f32.mxu0 %v712_v18 }
 0x21f   : > { %834 = vmatmul.mubr.f32.gmra.mrb[18].mxu0 %v711_v20  ;;  %v713_v22 = vmax.f32 %v675_v0, 0.0  ;;  %v919_v20 = vld [vmem:[#allocation4 + $0x8] sm:$0xff] }
 0x220   : > { %v714_v3 = vmax.f32 %v677_v21, 0.0  ;;  %v680_v6 = vpop.f32.mrb[6].mxu1  ;;  %v1417_v21 = vpack.c.bf16 %v919_v20, %v918_v19 }
 0x221   : > { %v681_v23 = vadd.f32 %v680_v6, %v589_v5  ;;  %v682_v24 = vpop.f32.mrb[7].mxu1 }
 0x222   : > { %v683_v25 = vadd.f32 %v682_v24, %v593_v7  ;;  %838 = vmatprep.mubr.f32.mxu0 %v714_v3  ;;  %1418 = vmatprep.subr.bf16.mxu0 %v1417_v21  ;;  %v921_v24 = vld [vmem:[#allocation4 + $0x18] sm:$0xff] }
 0x223   : > { %839 = vmatmul.mubr.f32.gmra.mrb[20].mxu0 %v713_v22  ;;  %v715_v28 = vmax.f32 %v681_v23, 0.0  ;;  %v920_v23 = vld [vmem:[#allocation4 + $0x10] sm:$0xff] }
 0x224   : > { %v716_v26 = vmax.f32 %v683_v25, 0.0  ;;  %v686_v27 = vpop.f32.mrb[8].mxu1  ;;  %1420 = vmatpush3.bf16.msra.mxu0 %v1417_v21 }
 0x225   : > { %v687_v29 = vadd.f32 %v686_v27, %v589_v5  ;;  %v688_v30 = vpop.f32.mrb[9].mxu1  ;;  %v1421_v27 = vpack.c.bf16 %v921_v24, %v920_v23 }
 0x226   : > { %v689_v31 = vadd.f32 %v688_v30, %v593_v7  ;;  %843 = vmatprep.mubr.f32.mxu0 %v716_v26 }
 0x227   : > { %844 = vmatmul.mubr.f32.gmra.mrb[22].mxu0 %v715_v28  ;;  %v717_v34 = vmax.f32 %v687_v29, 0.0  ;;  %1422 = vmatprep.subr.bf16.mxu0 %v1421_v27 }
 0x228   : > { %v718_v32 = vmax.f32 %v689_v31, 0.0  ;;  %v692_v33 = vpop.f32.mrb[10].mxu1  ;;  %1424 = vmatpush3.bf16.msra.mxu0 %v1421_v27  ;;  %v922_v31 = vld [vmem:[#allocation4 + $0x20] sm:$0xff] }
 0x229   : > { %v693_v35 = vadd.f32 %v692_v33, %v589_v5  ;;  %v694_v36 = vpop.f32.mrb[11].mxu1 }
 0x22a   : > { %v695_v37 = vadd.f32 %v694_v36, %v593_v7  ;;  %848 = vmatprep.mubr.f32.mxu0 %v718_v32  ;;  %v923_v32 = vld [vmem:[#allocation4 + $0x28] sm:$0xff] }
 0x22b   : > { %849 = vmatmul.mubr.f32.gmra.mrb[24].mxu0 %v717_v34  ;;  %v719_v40 = vmax.f32 %v693_v35, 0.0  ;;  %v1425_v35 = vpack.c.bf16 %v923_v32, %v922_v31 }
 0x22c   : > { %v720_v38 = vmax.f32 %v695_v37, 0.0  ;;  %v698_v39 = vpop.f32.mrb[12].mxu1  ;;  %v924_v37 = vld [vmem:[#allocation4 + $0x30] sm:$0xff] }
 0x22d   : > { %v699_v41 = vadd.f32 %v698_v39, %v589_v5  ;;  %v700_v42 = vpop.f32.mrb[13].mxu1  ;;  %1426 = vmatprep.subr.bf16.mxu0 %v1425_v35 }
 0x22e   : > { %v701_v43 = vadd.f32 %v700_v42, %v593_v7  ;;  %853 = vmatprep.mubr.f32.mxu0 %v720_v38  ;;  %1428 = vmatpush3.bf16.msra.mxu0 %v1425_v35  ;;  %v925_v38 = vld [vmem:[#allocation4 + $0x38] sm:$0xff] }
 0x22f   : > { %854 = vmatmul.mubr.f32.gmra.mrb[26].mxu0 %v719_v40  ;;  %v721_v46 = vmax.f32 %v699_v41, 0.0  ;;  %v1429_v40 = vpack.c.bf16 %v925_v38, %v924_v37 }
 0x230   : > { %v722_v44 = vmax.f32 %v701_v43, 0.0  ;;  %v704_v45 = vpop.f32.mrb[14].mxu1 }
 0x231   : > { %v705_v47 = vadd.f32 %v704_v45, %v589_v5  ;;  %v706_v48 = vpop.f32.mrb[15].mxu1  ;;  %1430 = vmatprep.subr.bf16.mxu0 %v1429_v40 }
 0x232   : > { %v707_v49 = vadd.f32 %v706_v48, %v593_v7  ;;  %858 = vmatprep.mubr.f32.mxu1 %v722_v44  ;;  %1432 = vmatpush3.bf16.msra.mxu0 %v1429_v40 }
 0x233   : > { %859 = vmatmul.mubr.f32.vlgmr.msra.gmra.mrb[16].mxu1 %v721_v46  ;;  %v723_v51 = vmax.f32 %v705_v47, 0.0 }
 0x234   : > { %v724_v50 = vmax.f32 %v707_v49, 0.0 }
 0x236   : > { %863 = vmatprep.mubr.f32.mxu1 %v724_v50 }
 0x237   : > { %864 = vmatmul.mubr.f32.gmra.mrb[18].mxu1 %v723_v51 }
 0x2ee   : > { %v1221_v52 = vpop.f32.mrb[16].mxu0 }
 0x2ef   : > { %v1222_v53 = vpop.f32.mrb[17].mxu0 }
 0x2f0   : > { %v1223_v55 = vadd.f32 %v1222_v53, %v1221_v52 }
 0x2f2   : > { %v1224_v56 = vpop.f32.mrb[18].mxu0  ;;  %v2039_v57 = vadd.f32 %v1223_v55, %v1178_v54 }
 0x2f3   : > { %v1225_v58 = vpop.f32.mrb[19].mxu0 }
 0x2f4   : > { %v1226_v59 = vadd.f32 %v1225_v58, %v1224_v56  ;;  %v870_v60 = vsel %vm869_vm0, %v2039_v57, -inf }
 0x2f5   : > { %871 = vmax.xlane.f32.xlu0 %v870_v60 }
 0x2f6   : > { %v1227_v61 = vpop.f32.mrb[20].mxu0  ;;  %v2043_v62 = vadd.f32 %v1226_v59, %v1178_v54 }
 0x2f7   : > { %v1228_v63 = vpop.f32.mrb[21].mxu0 }
 0x2f8   : > { %v1229_v1 = vadd.f32 %v1228_v63, %v1227_v61  ;;  %v873_v2 = vsel %vm869_vm0, %v2043_v62, -inf }
 0x2f9   : > { %874 = vmax.xlane.f32.xlu0 %v873_v2 }
 0x2fa   : > { %v1230_v5 = vpop.f32.mrb[22].mxu0  ;;  %v841_v7 = vadd.f32 %v1229_v1, %v1178_v54 }
 0x2fb   : > { %v1231_v8 = vpop.f32.mrb[23].mxu0 }
 0x2fc   : > { %v1232_v9 = vadd.f32 %v1231_v8, %v1230_v5  ;;  %v876_v10 = vsel %vm869_vm0, %v841_v7, -inf }
 0x2fd   : > { %877 = vmax.xlane.f32.xlu1 %v876_v10 }
 0x2fe   : > { %v1233_v11 = vpop.f32.mrb[24].mxu0  ;;  %v846_v12 = vadd.f32 %v1232_v9, %v1178_v54 }
 0x2ff   : > { %v1234_v13 = vpop.f32.mrb[25].mxu0 }
 0x300   : > { %v1235_v14 = vadd.f32 %v1234_v13, %v1233_v11  ;;  %v879_v15 = vsel %vm869_vm0, %v846_v12, -inf }
 0x301   : > { %880 = vmax.xlane.f32.xlu1 %v879_v15 }
 0x302   : > { %v1236_v16 = vpop.f32.mrb[26].mxu0  ;;  %v851_v17 = vadd.f32 %v1235_v14, %v1178_v54 }
 0x303   : > { %v1237_v18 = vpop.f32.mrb[27].mxu0 }
 0x304   : > { %v1238_v0 = vadd.f32 %v1237_v18, %v1236_v16  ;;  %v882_v4 = vsel %vm869_vm0, %v851_v17, -inf }
 0x305   : > { %883 = vmax.xlane.f32.xlu0 %v882_v4 }
 0x306   : > { %v1239_v3 = vpop.f32.mrb[16].mxu1  ;;  %v856_v6 = vadd.f32 %v1238_v0, %v1178_v54 }
 0x307   : > { %v1240_v22 = vpop.f32.mrb[17].mxu1 }
 0x308   : > { %v1241_v25 = vadd.f32 %v1240_v22, %v1239_v3  ;;  %v885_v26 = vsel %vm869_vm0, %v856_v6, -inf }
 0x309   : > { %886 = vmax.xlane.f32.xlu1 %v885_v26 }
 0x30a   : > { %v1242_v28 = vpop.f32.mrb[18].mxu1  ;;  %v861_v29 = vadd.f32 %v1241_v25, %v1178_v54 }
 0x30b   : > { %v1243_v30 = vpop.f32.mrb[19].mxu1 }
 0x30c   : > { %v1244_v33 = vadd.f32 %v1243_v30, %v1242_v28  ;;  %v888_v34 = vsel %vm869_vm0, %v861_v29, -inf }
 0x30d   : > { %889 = vmax.xlane.f32.xlu0 %v888_v34 }
 0x30e   : > { %v866_v36 = vadd.f32 %v1244_v33, %v1178_v54 }
 0x310   : > { %v891_v39 = vsel %vm869_vm0, %v866_v36, -inf }
 0x311   : > { %892 = vmax.xlane.f32.xlu1 %v891_v39 }
 0x382   : > { %v872_v41 = vpop.xlane.xlu0 %871 }
 0x383   : > { %v2054_v42 = vsub.f32 %v2039_v57, %v872_v41 }
 0x385   : > { %v902_v43 = vmul.f32 1.442695, %v2054_v42 }
 0x386   : > { %v875_v44 = vpop.xlane.xlu0 %874 }
 0x387   : > { %1483 = vpow2.f32 %v902_v43  ;;  %v895_v45 = vsub.f32 %v2043_v62, %v875_v44 }
 0x389   : > { %v904_v46 = vmul.f32 1.442695, %v895_v45 }
 0x38a   : > { %v878_v47 = vpop.xlane.xlu1 %877 }
 0x38b   : > { %1485 = vpow2.f32 %v904_v46  ;;  %v2058_v48 = vsub.f32 %v841_v7, %v878_v47 }
 0x38d   : > { %v906_v49 = vmul.f32 1.442695, %v2058_v48 }
 0x38e   : > { %v881_v50 = vpop.xlane.xlu1 %880 }
 0x38f   : > { %1487 = vpow2.f32 %v906_v49  ;;  %v2061_v51 = vsub.f32 %v846_v12, %v881_v50 }
 0x391   : > { %v1484_v52 = vpop.eup %1483  ;;  %v908_v53 = vmul.f32 1.442695, %v2061_v51 }
 0x392   : > { %1277 = vmatprep.mubr.msk.f32.mxu0 %vm869_vm0, %v1484_v52  ;;  %v884_v54 = vpop.xlane.xlu0 %883 }
 0x393   : > { %1489 = vpow2.f32 %v908_v53  ;;  %v2065_v55 = vsub.f32 %v851_v17, %v884_v54 }
 0x395   : > { %v1486_v56 = vpop.eup %1485  ;;  %v910_v57 = vmul.f32 1.442695, %v2065_v55 }
 0x396   : > { %v887_v58 = vpop.xlane.xlu1 %886  ;;  %1278 = vmatmul.mubr.msk.f32.vlgmr.msra.gmra.mrb[28].mxu0 %vm869_vm0, %v1486_v56 }
 0x397   : > { %1491 = vpow2.f32 %v910_v57  ;;  %v2069_v59 = vsub.f32 %v856_v6, %v887_v58 }
 0x399   : > { %v1488_v60 = vpop.eup %1487  ;;  %v912_v61 = vmul.f32 1.442695, %v2069_v59 }
 0x39a   : > { %1280 = vmatprep.mubr.msk.f32.mxu0 %vm869_vm0, %v1488_v60  ;;  %v890_v62 = vpop.xlane.xlu0 %889 }
 0x39b   : > { %1493 = vpow2.f32 %v912_v61  ;;  %v2073_v63 = vsub.f32 %v861_v29, %v890_v62 }
 0x39d   : > { %v1490_v1 = vpop.eup %1489  ;;  %v914_v2 = vmul.f32 1.442695, %v2073_v63 }
 0x39e   : > { %v893_v5 = vpop.xlane.xlu1 %892  ;;  %1281 = vmatmul.mubr.msk.f32.gmra.mrb[30].mxu0 %vm869_vm0, %v1490_v1 }
 0x39f   : > { %1495 = vpow2.f32 %v914_v2  ;;  %v901_v7 = vsub.f32 %v866_v36, %v893_v5 }
 0x3a1   : > { %v1492_v8 = vpop.eup %1491  ;;  %v916_v9 = vmul.f32 1.442695, %v901_v7 }
 0x3a2   : > { %1283 = vmatprep.mubr.msk.f32.mxu0 %vm869_vm0, %v1492_v8 }
 0x3a3   : > { %1497 = vpow2.f32 %v916_v9 }
 0x3a5   : > { %v1494_v10 = vpop.eup %1493 }
 0x3a6   : > { %1284 = vmatmul.mubr.msk.f32.gmra.mrb[32].mxu0 %vm869_vm0, %v1494_v10 }
 0x3a9   : > { %v1496_v11 = vpop.eup %1495 }
 0x3aa   : > { %1286 = vmatprep.mubr.msk.f32.mxu0 %vm869_vm0, %v1496_v11 }
 0x3ad   : > { %v1498_v12 = vpop.eup %1497 }
 0x3ae   : > { %1287 = vmatmul.mubr.msk.f32.gmra.mrb[34].mxu0 %vm869_vm0, %v1498_v12 }
 0x469   : > { %v1279_v13 = vpop.f32.mrb[28].mxu0 }
 0x46a   : > { %1499 = vlog2.f32 %v1279_v13  ;;  %v1016_v14 = vpop.f32.mrb[29].mxu0 }
 0x46b   : > { %1501 = vlog2.f32 %v1016_v14 }
 0x471   : > { %v1282_v15 = vpop.f32.mrb[30].mxu0 }
 0x472   : > { %1503 = vlog2.f32 %v1282_v15  ;;  %v1026_v16 = vpop.f32.mrb[31].mxu0 }
 0x473   : > { %1505 = vlog2.f32 %v1026_v16 }
 0x474   : > { %v1500_v17 = vpop.eup %1499 }
 0x475   : > { %v1502_v18 = vpop.eup %1501  ;;  %v1058_v19 = vmul.f32 0.6931472, %v1500_v17 }
 0x476   : > { %v1056_v20 = vmul.f32 0.6931472, %v1502_v18 }
 0x477   : > { %v1072_v0 = vsub.f32 %v895_v45, %v1058_v19 }
 0x478   : > { %v1071_v4 = vsub.f32 %v2054_v42, %v1056_v20 }
 0x479   : > { %1080 = vst.msk [vmem:[%s2086_s22 + $0x8] sm:$0xff] %vm869_vm0, %v1072_v0  ;;  %v1285_v21 = vpop.f32.mrb[32].mxu0 }
 0x47a   : > { %1079 = vst.msk [vmem:[%s2086_s22] sm:$0xff] %vm869_vm0, %v1071_v4  ;;  %1507 = vlog2.f32 %v1285_v21  ;;  %v1036_v3 = vpop.f32.mrb[33].mxu0 }
 0x47b   : > { %1509 = vlog2.f32 %v1036_v3 }
 0x47c   : > { %v1504_v6 = vpop.eup %1503 }
 0x47d   : > { %v1506_v22 = vpop.eup %1505  ;;  %v1062_v23 = vmul.f32 0.6931472, %v1504_v6 }
 0x47e   : > { %v1060_v24 = vmul.f32 0.6931472, %v1506_v22 }
 0x47f   : > { %v1074_v25 = vsub.f32 %v2061_v51, %v1062_v23 }
 0x480   : > { %v1073_v26 = vsub.f32 %v2058_v48, %v1060_v24 }
 0x481   : > { %1082 = vst.msk [vmem:[%s2086_s22 + $0x18] sm:$0xff] %vm869_vm0, %v1074_v25  ;;  %v1288_v27 = vpop.f32.mrb[34].mxu0 }
 0x482   : > { %1081 = vst.msk [vmem:[%s2086_s22 + $0x10] sm:$0xff] %vm869_vm0, %v1073_v26  ;;  %1511 = vlog2.f32 %v1288_v27  ;;  %v1046_v28 = vpop.f32.mrb[35].mxu0 }
 0x483   : > { %1513 = vlog2.f32 %v1046_v28 }
 0x484   : > { %v1508_v29 = vpop.eup %1507 }
 0x485   : > { %v1510_v30 = vpop.eup %1509  ;;  %v1066_v31 = vmul.f32 0.6931472, %v1508_v29 }
 0x486   : > { %v1064_v32 = vmul.f32 0.6931472, %v1510_v30 }
 0x487   : > { %v1076_v33 = vsub.f32 %v2069_v59, %v1066_v31 }
 0x488   : > { %v1075_v34 = vsub.f32 %v2065_v55, %v1064_v32 }
 0x489   : > { %1084 = vst.msk [vmem:[%s2086_s22 + $0x28] sm:$0xff] %vm869_vm0, %v1076_v33 }
 0x48a   : > { %1083 = vst.msk [vmem:[%s2086_s22 + $0x20] sm:$0xff] %vm869_vm0, %v1075_v34 }
 0x48c   : > { %v1512_v35 = vpop.eup %1511 }
 0x48d   : > { %v1514_v36 = vpop.eup %1513  ;;  %v1070_v37 = vmul.f32 0.6931472, %v1512_v35 }
 0x48e   : > { %v1068_v38 = vmul.f32 0.6931472, %v1514_v36 }
 0x48f   : > { %v1078_v39 = vsub.f32 %v901_v7, %v1070_v37 }
 0x490   : > { %v1077_v40 = vsub.f32 %v2073_v63, %v1068_v38 }
 0x491   : > { %1086 = vst.msk [vmem:[%s2086_s22 + $0x38] sm:$0xff] %vm869_vm0, %v1078_v39 }
 0x492   : > { %1085 = vst.msk [vmem:[%s2086_s22 + $0x30] sm:$0xff] %vm869_vm0, %v1077_v40 }
 0x493 PF: > { %s20_s27 = sadd.s32 1, %s1585_s27  }
 0x494   : > { %p17_p2 = scmp.ge.s32.totalorder %s20_s27, 4  }
 0x496   :  { %19 = sbr.rel (!%p17_p2) target bundleno = 2 (0x2), region = 91 }
 0x49d   :  { %1109 = vsyncpa [#allocation3], 1 }
 0x49e   :  { %1111 = vsyncpa [#allocation3 + $0x1], 1 }
 0x49f   :  { %1112 = vsyncpa [#allocation5], 1 }

</bundles_post_ra>
